<compile_context>
chip_gen: v6e
topology: v6e:2x2x1
jax: 0.10.0
libtpu: 0.0.40
codegen_flags: <defaults>
</compile_context>

<pallas_src>
import functools

import jax
import jax.numpy as jnp
from jax.experimental import pallas as pl
from jax.experimental.pallas import tpu as pltpu

LANE = 128
SUBLANE = 8


def _kl_pointwise(x, t):
    """t * (log(t) - x) with 0*log(0) := 0  (f32 math)."""
    return t * (jnp.log(jnp.where(t > 0, t, 1.0)) - x)


# --------------------------------------------------------------------------
# Kernels
# --------------------------------------------------------------------------
def _kl_none_kernel(x_ref, t_ref, o_ref):
    x = x_ref[...].astype(jnp.float32)
    t = t_ref[...].astype(jnp.float32)
    o_ref[...] = _kl_pointwise(x, t).astype(o_ref.dtype)


def _kl_block_sum_kernel(x_ref, t_ref, p_ref, *, valid_rows_last, accumulate):
    """Reduce one (block_rows, 128) block to an (8, 128) partial.

    accumulate=True : single resident (8,128) accumulator (single-TC chips).
    accumulate=False: one (8,128) partial per block ('parallel' grid, v7x).
    valid_rows_last : number of valid rows in the last block, or None when the
                      grid divides the rows exactly (mask statically elided).
    """
    i = pl.program_id(0)
    last = pl.num_programs(0) - 1

    if accumulate:
        @pl.when(i == 0)
        def _():
            p_ref[...] = jnp.zeros_like(p_ref)

    x = x_ref[...].astype(jnp.float32)
    t = t_ref[...].astype(jnp.float32)
    loss = _kl_pointwise(x, t)

    def _write(val):
        # Pure elementwise vreg adds (no cross-lane XLU reduce in the kernel).
        partial = val.reshape(-1, SUBLANE, LANE).sum(axis=0)
        if accumulate:
            p_ref[...] += partial
        else:
            p_ref[...] = partial

    if valid_rows_last is None:
        _write(loss)
    else:
        @pl.when(i != last)
        def _():
            _write(loss)

        @pl.when(i == last)
        def _():
            # Post-compute select: OOB rows may hold garbage (even NaN); a
            # select (not a multiplicative mask) keeps them out of the sum.
            row_ids = jax.lax.broadcasted_iota(jnp.int32, loss.shape, 0)
            _write(jnp.where(row_ids < valid_rows_last, loss, 0.0))


# --------------------------------------------------------------------------
# Host-side helpers
# --------------------------------------------------------------------------
@functools.lru_cache(maxsize=1)
def _device_defaults():
    """(default_block_rows, two_tensorcores) for the local TPU generation."""
    try:
        kind = jax.devices()[0].device_kind.lower()
    except Exception:  # pragma: no cover - no device available at trace time
        kind = ""
    two_tc = ("v7" in kind) or ("7x" in kind)
    if two_tc or ("v6" in kind):
        return 8192, two_tc              # 4 MiB f32 blocks, fits 32 MiB scoped VMEM
    return 4096, False                   # v5e / unknown: fits 16 MiB scoped VMEM


def _round_up(v, m):
    return ((v + m - 1) // m) * m


def _choose_block_rows(rows, requested, two_tc):
    """Pick a sublane-aligned block height and the resulting grid size."""
    brows = min(_round_up(requested, SUBLANE), _round_up(rows, SUBLANE))
    if two_tc and rows >= 2 * SUBLANE:
        # Guarantee >= 2 blocks so the 'parallel' grid shards across both TCs.
        half = (rows // 2) // SUBLANE * SUBLANE
        brows = min(brows, max(SUBLANE, half))
    num_blocks = pl.cdiv(rows, brows)
    return brows, num_blocks


def kl_div_pallas(set1, set2, reduction="mean", block_rows=None, two_tc=None):
    if set1.shape != set2.shape:
        raise ValueError("set1 and set2 must have the same shape")
    if reduction not in ("none", "sum", "mean", "batchmean"):
        raise ValueError(f"Unknown reduction: {reduction}")

    orig_shape = set1.shape
    orig_dtype = set1.dtype

    dflt_rows, dflt_two_tc = _device_defaults()
    if block_rows is None:
        block_rows = dflt_rows
    if two_tc is None:
        two_tc = dflt_two_tc

    flat_x = set1.reshape(-1)
    flat_t = set2.reshape(-1)
    n = flat_x.shape[0]
    main = (n // LANE) * LANE          # lane-aligned prefix -> Pallas kernel
    tail = n - main                    # < 128 trailing elements -> plain JAX

    if tail == 0:
        x_main, t_main = flat_x, flat_t
    else:
        x_main, t_main = flat_x[:main], flat_t[:main]

    # ---------------------------- reduction='none' --------------------------
    if reduction == "none":
        pieces = []
        if main > 0:
            rows = main // LANE
            brows, num_blocks = _choose_block_rows(rows, block_rows, two_tc)
            out2d = pl.pallas_call(
                _kl_none_kernel,
                out_shape=jax.ShapeDtypeStruct((rows, LANE), orig_dtype),
                grid=(num_blocks,),
                in_specs=[pl.BlockSpec((brows, LANE), lambda i: (i, 0))] * 2,
                out_specs=pl.BlockSpec((brows, LANE), lambda i: (i, 0)),
                compiler_params=pltpu.CompilerParams(
                    dimension_semantics=("parallel",)),
            )(x_main.reshape(rows, LANE), t_main.reshape(rows, LANE))
            pieces.append(out2d.reshape(-1))
        if tail > 0:
            tx = flat_x[main:].astype(jnp.float32)
            tt = flat_t[main:].astype(jnp.float32)
            pieces.append(_kl_pointwise(tx, tt).astype(orig_dtype))
        out_flat = pieces[0] if len(pieces) == 1 else jnp.concatenate(pieces)
        return out_flat.reshape(orig_shape)

    # ------------------------- 'sum' / 'mean' / 'batchmean' -----------------
    total = jnp.zeros((), jnp.float32)
    if main > 0:
        rows = main // LANE
        brows, num_blocks = _choose_block_rows(rows, block_rows, two_tc)
        needs_mask = (rows % brows) != 0
        valid_last = (rows - (num_blocks - 1) * brows) if needs_mask else None

        kernel = functools.partial(
            _kl_block_sum_kernel,
            valid_rows_last=valid_last,
            accumulate=not two_tc,
        )
        if two_tc:
            # One partial per block; 'parallel' so v7x shards across both TCs.
            out_shape = jax.ShapeDtypeStruct((num_blocks * SUBLANE, LANE), jnp.float32)
            out_spec = pl.BlockSpec((SUBLANE, LANE), lambda i: (i, 0))
            sem = ("parallel",)
        else:
            # Single resident accumulator tile; saves the partials HBM trip.
            out_shape = jax.ShapeDtypeStruct((SUBLANE, LANE), jnp.float32)
            out_spec = pl.BlockSpec((SUBLANE, LANE), lambda i: (0, 0))
            sem = ("arbitrary",)

        partials = pl.pallas_call(
            kernel,
            out_shape=out_shape,
            grid=(num_blocks,),
            in_specs=[pl.BlockSpec((brows, LANE), lambda i: (i, 0))] * 2,
            out_specs=out_spec,
            compiler_params=pltpu.CompilerParams(dimension_semantics=sem),
        )(x_main.reshape(rows, LANE), t_main.reshape(rows, LANE))
        total = total + jnp.sum(partials, dtype=jnp.float32)

    if tail > 0:
        tx = flat_x[main:].astype(jnp.float32)
        tt = flat_t[main:].astype(jnp.float32)
        total = total + jnp.sum(_kl_pointwise(tx, tt), dtype=jnp.float32)

    if reduction == "sum":
        res = total
    elif reduction == "mean":
        res = total / n
    else:  # batchmean
        res = total / orig_shape[0]
    return res.astype(orig_dtype)


class WrapperKLDiv:
    """Wrapper for KL-Divergence for easy argument passing (Pallas/TPU)."""

    def __init__(self, reduction: str = "mean") -> None:
        self.reduction = reduction

    def __call__(self, set1, set2):
        return kl_div_pallas(set1, set2, reduction=self.reduction)


# --------------------------------------------------------------------------
# Self-test
# --------------------------------------------------------------------------
def _reference_kl(set1, set2, reduction):
    x = set1.astype(jnp.float32)
    t = set2.astype(jnp.float32)
    loss = jnp.where(t > 0, t * jnp.log(jnp.where(t > 0, t, 1.0)), 0.0) - t * x
    if reduction == "none":
        return loss
    s = jnp.sum(loss)
    if reduction == "sum":
        return s
    if reduction == "mean":
        return s / loss.size
    if reduction == "batchmean":
        return s / set1.shape[0]
    raise ValueError(reduction)


if __name__ == "__main__":
    root_key = jax.random.PRNGKey(0)

    def make_inputs(shape, dtype, k):
        k1, k2 = jax.random.split(k)
        l1 = jax.random.normal(k1, shape, dtype=jnp.float32)
        l2 = jax.random.normal(k2, shape, dtype=jnp.float32)
        s1 = jax.nn.log_softmax(l1, axis=-1).astype(dtype)  # log-probs (input)
        s2 = jax.nn.softmax(l2, axis=-1).astype(dtype)      # probs (target)
        return s1, s2

    # (name, shape, dtype, block_rows, force_two_tc, atol, rtol)
    cases = [
        ("f32_aligned",            (2, 4, 16, 16), jnp.float32, None, None,  1e-5, 1e-4),
        ("f32_tail_only",          (3, 5, 7),      jnp.float32, None, None,  1e-5, 1e-4),
        ("f32_prefix_plus_tail",   (9, 130),       jnp.float32, None, None,  1e-5, 1e-4),
        ("f32_partial_last_block", (3, 8, 128),    jnp.float32, 16,   False, 1e-5, 1e-4),
        ("f32_partial_parallel",   (3, 8, 128),    jnp.float32, 16,   True,  1e-5, 1e-4),
        ("f32_rows_lt_sublane",    (3, 128),       jnp.float32, None, None,  1e-5, 1e-4),
        ("bf16",                   (2, 4, 16, 16), jnp.bfloat16, None, None, 2e-2, 2e-2),
    ]

    keys = jax.random.split(root_key, len(cases))
    ok = True
    for (name, shape, dtype, br, force_tc, atol, rtol), k in zip(cases, keys):
        s1, s2 = make_inputs(shape, dtype, k)
        for reduction in ("mean", "sum", "batchmean", "none"):
            if br is None and force_tc is None:
                out = WrapperKLDiv(reduction=reduction)(s1, s2)
            else:
                out = kl_div_pallas(s1, s2, reduction=reduction,
                                    block_rows=br, two_tc=force_tc)
            out = jax.block_until_ready(out)
            ref = _reference_kl(s1, s2, reduction)
            o = jnp.asarray(out, dtype=jnp.float32)
            r = jnp.asarray(ref, dtype=jnp.float32)
            if o.shape != r.shape or not jnp.allclose(o, r, atol=atol, rtol=rtol):
                ok = False
                err = float(jnp.max(jnp.abs(o - r))) if o.shape == r.shape else -1.0
                print(f"MISMATCH {name} reduction={reduction} max_abs_err={err}")

    if ok:
        print("KERNEL_OK")
</pallas_src>

<mosaic_0001>
module attributes {stable_mosaic.version = 11 : i64} {
  func.func @_kl_block_sum_kernel(%arg0: i32, %arg1: memref<16x128xf32, #tpu.memory_space<vmem>>, %arg2: memref<16x128xf32, #tpu.memory_space<vmem>>, %arg3: memref<8x128xf32, #tpu.memory_space<vmem>>) attributes {dimension_semantics = [#tpu.dimension_semantics<arbitrary>], iteration_bounds = array<i64: 1>, scalar_prefetch = 0 : i64, scratch_operands = 0 : i64, tpu.core_type = #tpu.core_type<tc>, window_params = [{transform_indices = @transform_0, window_bounds = array<i64: 16, 128>}, {transform_indices = @transform_1, window_bounds = array<i64: 16, 128>}, {pipeline_mode = #tpu.pipeline_mode<synchronous>, transform_indices = @transform_2, window_bounds = array<i64: 8, 128>}]} {
    %c0_i32 = arith.constant 0 : i32
    %0 = arith.cmpi eq, %arg0, %c0_i32 : i32
    %1 = arith.extui %0 : i1 to i32
    %c0_i32_0 = arith.constant 0 : i32
    %2 = arith.cmpi ne, %1, %c0_i32_0 : i32
    scf.if %2 {
      %cst_10 = arith.constant 0.000000e+00 : f32
      %17 = vector.broadcast %cst_10 : f32 to vector<8x128xf32>
      %c0_11 = arith.constant 0 : index
      %c0_12 = arith.constant 0 : index
      %18 = vector.load %arg3[%c0_11, %c0_12] : memref<8x128xf32, #tpu.memory_space<vmem>>, vector<8x128xf32>
      tpu.vector_store %arg3[%c0_11, %c0_12], %17 {strides = array<i32>} : memref<8x128xf32, #tpu.memory_space<vmem>>, vector<8x128xf32>,
    } else {
    }
    %c0 = arith.constant 0 : index
    %c0_1 = arith.constant 0 : index
    %3 = vector.load %arg1[%c0, %c0_1] : memref<16x128xf32, #tpu.memory_space<vmem>>, vector<16x128xf32>
    %c0_2 = arith.constant 0 : index
    %c0_3 = arith.constant 0 : index
    %4 = vector.load %arg2[%c0_2, %c0_3] : memref<16x128xf32, #tpu.memory_space<vmem>>, vector<16x128xf32>
    %cst = arith.constant 0.000000e+00 : f32
    %5 = vector.broadcast %cst : f32 to vector<16x128xf32>
    %6 = arith.cmpf ogt, %4, %5 : vector<16x128xf32>
    %cst_4 = arith.constant 1.000000e+00 : f32
    %7 = vector.broadcast %cst_4 : f32 to vector<16x128xf32>
    %8 = arith.select %6, %4, %7 : vector<16x128xi1>, vector<16x128xf32>
    %9 = math.log %8 : vector<16x128xf32>
    %10 = arith.subf %9, %3 : vector<16x128xf32>
    %11 = arith.mulf %4, %10 : vector<16x128xf32>
    %12 = vector.shape_cast %11 : vector<16x128xf32> to vector<2x8x128xf32>
    %cst_5 = arith.constant dense<0.000000e+00> : vector<8x128xf32>
    %13 = vector.multi_reduction <add>, %12, %cst_5 [0] : vector<2x8x128xf32> to vector<8x128xf32>
    %c0_6 = arith.constant 0 : index
    %c0_7 = arith.constant 0 : index
    %14 = vector.load %arg3[%c0_6, %c0_7] : memref<8x128xf32, #tpu.memory_space<vmem>>, vector<8x128xf32>
    %15 = arith.addf %14, %13 : vector<8x128xf32>
    %c0_8 = arith.constant 0 : index
    %c0_9 = arith.constant 0 : index
    %16 = vector.load %arg3[%c0_8, %c0_9] : memref<8x128xf32, #tpu.memory_space<vmem>>, vector<8x128xf32>
    tpu.vector_store %arg3[%c0_8, %c0_9], %15 {strides = array<i32>} : memref<8x128xf32, #tpu.memory_space<vmem>>, vector<8x128xf32>,
    return
  }
  func.func @transform_0(%arg0: i32) -> (i32, i32) {
    %c0_i32 = arith.constant 0 : i32
    %c0_i32_0 = arith.constant 0 : i32
    return %arg0, %c0_i32 : i32, i32
  }
  func.func @transform_1(%arg0: i32) -> (i32, i32) {
    %c0_i32 = arith.constant 0 : i32
    %c0_i32_0 = arith.constant 0 : i32
    return %arg0, %c0_i32 : i32, i32
  }
  func.func @transform_2(%arg0: i32) -> (i32, i32) {
    %c0_i32 = arith.constant 0 : i32
    %c0_i32_0 = arith.constant 0 : i32
    %c0_i32_1 = arith.constant 0 : i32
    return %c0_i32, %c0_i32_0 : i32, i32
  }
}

</mosaic_0001>

<bundles_post_ra>
// kernel: tpu_custom_call.1
= control target key start
LH: loop header
LB: loop body
LE: loop exit
PB: predicated region body
PF: predicated region fallthrough
CT: control target
= control target key end

     0   :  { %7 = vsyncpa [#allocation3], 0  ;;  %s186_s0 = inlined_call_operand.hbm [shape: f32[16,128], index: 0, kind: input, shape index: {}]   ;;  %s187_s1 = inlined_call_operand.hbm [shape: f32[16,128], index: 1, kind: input, shape index: {}]   ;;  %s188_s2 = inlined_call_operand.hbm [shape: f32[8,128], index: 2, kind: output, shape index: {}]  }
   0x1   :  { %8 = vsyncpa [#allocation6], 0 }
   0x2   :  { %9 = vsyncpa [#allocation4], 0  ;;  %s157_s9 = smov [#allocation2]  }
   0x3   :  { %s15_s10 = sshll.u32 %s157_s9, 4  ;;  %s16_s10 = int_to_ptr.vmem [resolvable:$true] %s15_s10 }
   0x4   :  { %s99_s11 = scalar_lea.vmem %s16_s10, 256  ;;  %p104_p1 = scmp.lt.s32.totalorder %s16_s10, %s16_s10 }
   0x5   :  { %p100_p0 = scmp.ne.s32.totalorder %s16_s10, %s99_s11  ;;  %p105_p2 = scmp.lt.s32.totalorder %s99_s11, %s99_s11 }
   0x7   :  { %p106_p3 = por %p105_p2, %p104_p1 }
   0x9   :  { %p107_p4 = pnand %p106_p3, %p100_p0 }
   0xb   :  { %110 = shalt.err (!%p107_p4)
}
   0xc   :  { %s158_s12 = smov 128   ;;  %s159_s13 = smov 8  }
   0xd   :  { %21 = dma.hbm_to_vmem [thread:$0]  %s186_s0, 256, %s16_s10, [#allocation3], %s158_s12, %s158_s12, %s159_s13  }
   0xe   :  { %s160_s16 = smov [#allocation5]  }
   0xf   :  { %s27_s17 = sshll.u32 %s160_s16, 4  ;;  %s28_s17 = int_to_ptr.vmem [resolvable:$true] %s27_s17 }
  0x10   :  { %s119_s18 = scalar_lea.vmem %s28_s17, 256  ;;  %p124_p6 = scmp.lt.s32.totalorder %s28_s17, %s28_s17 }
  0x11   :  { %p120_p5 = scmp.ne.s32.totalorder %s28_s17, %s119_s18  ;;  %p125_p7 = scmp.lt.s32.totalorder %s119_s18, %s119_s18 }
  0x13   :  { %p126_p8 = por %p125_p7, %p124_p6 }
  0x15   :  { %p127_p9 = pnand %p126_p8, %p120_p5 }
  0x17   :  { %130 = shalt.err (!%p127_p9)
}
  0x18   :  { %33 = dma.hbm_to_vmem [thread:$0]  %s187_s1, 256, %s28_s17, [#allocation6], %s158_s12, %s158_s12, %s159_s13  }
  0x19   :  { %151 = dma.done.wait [#allocation3], 256  }
  0x1a   :  { %152 = vsyncadd [#allocation3], 4294967040 }
  0x1b   :  { %153 = dma.done.wait [#allocation6], 256  }
  0x1c   :  { %154 = vsyncadd [#allocation6], 4294967040  ;;  %v47_v0 = vld [vmem:[#allocation5] sm:$0xff]  ;;  %v48_v1 = vld [vmem:[#allocation5 + $0x8] sm:$0xff]  ;;  %s161_s0 = smov [#allocation7]  }
  0x1d   :  { %vm49_vm0 = vcmp.gt.f32.partialorder %v47_v0, 0.0  ;;  %vm50_vm1 = vcmp.gt.f32.partialorder %v48_v1, 0.0  ;;  %v45_v5 = vld [vmem:[#allocation2] sm:$0xff]  ;;  %v46_v7 = vld [vmem:[#allocation2 + $0x8] sm:$0xff]  ;;  %s71_s1 = sshll.u32 %s161_s0, 4  ;;  %s72_s1 = int_to_ptr.vmem [resolvable:$true] %s71_s1 }
  0x1e   :  { %v51_v2 = vsel %vm49_vm0, %v47_v0, 1.0  ;;  %v52_v3 = vsel %vm50_vm1, %v48_v1, 1.0  ;;  %s131_s21 = scalar_lea.vmem %s72_s1, 128  ;;  %p136_p11 = scmp.lt.s32.totalorder %s72_s1, %s72_s1 }
  0x1f   :  { %87 = vlog2.f32 %v51_v2  ;;  %p132_p10 = scmp.ne.s32.totalorder %s72_s1, %s131_s21  ;;  %p137_p12 = scmp.lt.s32.totalorder %s131_s21, %s131_s21 }
  0x20   :  { %89 = vlog2.f32 %v52_v3 }
  0x21   :  { %p138_p13 = por %p137_p12, %p136_p11 }
  0x23   :  { %p139_p0 = pnand %p138_p13, %p132_p10 }
  0x2c   :  { %v88_v4 = vpop.eup %87 }
  0x2d   :  { %v90_v6 = vpop.eup %89  ;;  %v54_v8 = vmul.f32 0.6931472, %v88_v4 }
  0x2e   :  { %v56_v9 = vmul.f32 0.6931472, %v90_v6 }
  0x2f   :  { %v57_v10 = vsub.f32 %v54_v8, %v45_v5 }
  0x30   :  { %v58_v11 = vsub.f32 %v56_v9, %v46_v7 }
  0x31   :  { %v59_v12 = vmul.f32 %v57_v10, %v47_v0 }
  0x32   :  { %v60_v13 = vmul.f32 %v58_v11, %v48_v1 }
  0x34   :  { %v61_v14 = vadd.f32 %v60_v13, %v59_v12 }
  0x36   :  { %64 = vst [vmem:[#allocation7] sm:$0xff] %v61_v14 }
  0x37   :  { %142 = shalt.err (!%p139_p0)
}
  0x38   :  { %74 = dma.vmem_to_hbm [thread:$0]  %s72_s1, 128, %s188_s2, [#allocation4]  }
  0x39   :  { %155 = dma.done.wait [#allocation4], 128  }
  0x3a   :  { %156 = vsyncadd [#allocation4], 4294967168 }
  0x3b   :  { %78 = vsyncpa [#allocation3], 1 }
  0x3c   :  { %79 = vsyncpa [#allocation6], 1 }
  0x3d   :  { %80 = vsyncpa [#allocation4], 1 }

</bundles_post_ra>
